<compile_context>
chip_gen: v7x
topology: tpu7x:2x2x1
jax: 0.10.0
libtpu: 0.0.40
codegen_flags: <defaults>
</compile_context>

<pallas_src>
import math

import jax
import jax.numpy as jnp
from jax.experimental import pallas as pl
from jax.experimental.pallas import tpu as pltpu


def _round_up(v, m):
    return (v + m - 1) // m * m


def _attn_head_kernel(x_ref, w_kqv_ref, o_ref):
    """One grid step: full attention over a (bd0, T, C) slab of x.

    x_ref:     (bd0, T, C)   input slab, native dtype.
    w_kqv_ref: (C, 3*HP)     fused [K | Q | V] projection; each panel padded to
                             a multiple of 128 lanes; 1/sqrt(embed) folded into Q.
    o_ref:     (bd0, T, HP)  lane-dense (padded) output block.
    """
    bd0, T, C = x_ref.shape
    HP = w_kqv_ref.shape[1] // 3

    x = x_ref[...]                  # native dtype straight to the MXU
    dt = x.dtype
    w_kqv = w_kqv_ref[...]

    # Fused K/Q/V projection: one weight-stationary MXU pass over the slab.
    # Leading-dim-only reshapes (last dim preserved) -> no cross-tile relayout
    # when T % 8 == 0.
    kqv = jnp.dot(x.reshape(bd0 * T, C), w_kqv,
                  preferred_element_type=jnp.float32)          # (bd0*T, 3*HP) f32
    kqv = kqv.reshape(bd0, T, 3 * HP)

    # 128-aligned lane slices -> whole-vreg selections (no XLU rotates). Cast
    # back to the input dtype so bf16 inputs hit the native MXU rate; the
    # zero-padded lanes stay exactly zero.
    k = kqv[:, :, 0:HP].astype(dt)
    q = kqv[:, :, HP:2 * HP].astype(dt)
    v = kqv[:, :, 2 * HP:3 * HP].astype(dt)

    # Scores.  The 1/sqrt(embed_size) scale is already folded into w_q; the
    # zero padding of the head dim contributes nothing to the contraction.
    s = jnp.einsum("bqh,bkh->bqk", q, k, preferred_element_type=jnp.float32)

    # Causal mask built in-kernel (== tril[:T, :T] == 0 -> masked); finite fill
    # keeps exp() NaN-free and the diagonal is never masked.
    row = jax.lax.broadcasted_iota(jnp.int32, (T, T), 0)
    col = jax.lax.broadcasted_iota(jnp.int32, (T, T), 1)
    s = jnp.where((row >= col)[None, :, :], s, -1e30)

    # Numerically-stable softmax in f32 (v5e has no bf16 VPU/EUP).
    m = jnp.max(s, axis=-1, keepdims=True)
    e = jnp.exp(s - m)
    p = e * pl.reciprocal(jnp.sum(e, axis=-1, keepdims=True), approx=False)
    p = p.astype(dt)

    # P @ V; writing the padded (..., HP) block keeps the HBM store lane-dense
    # (unmasked vst) on v5e/v6e/v7x.
    o = jnp.einsum("bqk,bkh->bqh", p, v, preferred_element_type=jnp.float32)
    o_ref[...] = o.astype(o_ref.dtype)


def fuse_attention_head_weights(w_key, w_query, w_value, embed_size):
    """Build the fused projection weight ONCE (module-init time, not per call).

    Returns a (C, 3*HP) array laid out as [K | Q | V] where each panel is
    padded to a multiple of 128 lanes (vreg-aligned in-kernel slices,
    lane-dense PV output) and the 1/sqrt(embed_size) attention scale is folded
    into the Q panel.
    """
    C, H = w_key.shape
    HP = _round_up(H, 128)
    scale = jnp.asarray(1.0 / math.sqrt(embed_size), dtype=w_query.dtype)

    def pad(w):
        return jnp.pad(w, ((0, 0), (0, HP - H)))

    return jnp.concatenate([pad(w_key), pad(w_query * scale), pad(w_value)], axis=1)


_F32 = 4
_VMEM_BUDGET = 24 * 1024 * 1024   # fits v7x's 32 MiB default scoped VMEM with headroom


def _per_step_vmem_bytes(bd0, T, C, HP, itemsize):
    """Rough per-grid-step VMEM: double-buffered x/out blocks, resident fused
    weight, plus the f32 intermediates (kqv, q/k/v casts, scores + exp)."""
    return (2 * bd0 * T * C * itemsize          # x blocks (double buffered)
            + 2 * bd0 * T * HP * itemsize       # out blocks (double buffered)
            + C * 3 * HP * itemsize             # resident fused weight
            + bd0 * T * 3 * HP * _F32           # kqv accumulator
            + 3 * bd0 * T * HP * itemsize       # q/k/v casts
            + 2 * bd0 * T * T * _F32)           # scores + exp


def _pick_n_steps(D0, T, C, HP, itemsize):
    """Single grid step unless VMEM pressure forces tiling over D0.

    Per-grid-step overhead is ~0.35us, so splitting tiny slabs is pure
    serialization on single-TensorCore v5e/v6e and not worth cross-core
    launch/sync on v7x either.  When the whole slab would overflow the scoped
    VMEM budget, use the fewest evenly-dividing steps that fit.
    """
    n = 1
    while n < D0 and (D0 % n != 0
                      or _per_step_vmem_bytes(D0 // n, T, C, HP, itemsize) > _VMEM_BUDGET):
        n += 1
    return n


def attention_head(x, w_kqv, head_size):
    """x: (D0, D1, C); w_kqv: fused (C, 3*HP) weight from
    fuse_attention_head_weights().  Returns (D0, D1, head_size)."""
    D0, T, C = x.shape
    HP = w_kqv.shape[1] // 3
    itemsize = jnp.dtype(x.dtype).itemsize

    n_steps = _pick_n_steps(D0, T, C, HP, itemsize)
    bd0 = D0 // n_steps
    vmem_est = _per_step_vmem_bytes(bd0, T, C, HP, itemsize)
    vmem_limit = int(min(48 << 20, max(32 << 20, 2 * vmem_est)))

    out = pl.pallas_call(
        _attn_head_kernel,
        out_shape=jax.ShapeDtypeStruct((D0, T, HP), x.dtype),
        grid_spec=pltpu.PrefetchScalarGridSpec(
            num_scalar_prefetch=0,
            grid=(n_steps,),
            in_specs=[
                pl.BlockSpec((bd0, T, C), lambda b: (b, 0, 0)),   # x slab
                pl.BlockSpec((C, 3 * HP), lambda b: (0, 0)),      # fused W_kqv (resident)
            ],
            out_specs=pl.BlockSpec((bd0, T, HP), lambda b: (b, 0, 0)),
        ),
        compiler_params=pltpu.CompilerParams(
            # Steps (when > 1) are independent D0 slabs.
            # TODO(synk): for multi-microsecond slabs on v7x, use
            # pltpu.CORE_PARALLEL / pl.core_map to guarantee megacore sharding.
            dimension_semantics=("parallel",),
            vmem_limit_bytes=vmem_limit,
        ),
    )(x, w_kqv)

    # Drop the lane padding (no-op when head_size is already a 128-multiple).
    if HP != head_size:
        out = out[:, :, :head_size]
    return out


def attention_head_ref(x, w_key, w_query, w_value):
    """Pure-JAX reference mirroring the PyTorch forward (eval-mode dropout)."""
    D0, D1, C = x.shape
    k = x @ w_key
    q = x @ w_query
    v = x @ w_value
    w = (q @ jnp.swapaxes(k, -2, -1)) / math.sqrt(C)
    tril = jnp.tril(jnp.ones((D1, D1), dtype=jnp.float32))
    w = jnp.where(tril == 0, -jnp.inf, w)
    w = jax.nn.softmax(w, axis=-1)
    return w @ v


if __name__ == "__main__":
    # Module hyperparameters (small, consistent with the forward pass).
    n_embd = 32
    head_size = 16
    block_size = 8
    D0, D1 = 2, block_size  # x: (block_size, batch_size, embed_size) per forward() naming

    key = jax.random.PRNGKey(0)
    kx, kk, kq, kv = jax.random.split(key, 4)

    x = jax.random.normal(kx, (D0, D1, n_embd), dtype=jnp.float32)
    # nn.Linear(n_embd, head_size, bias=False) weights, stored pre-transposed (n_embd, head_size).
    bound = 1.0 / math.sqrt(n_embd)
    w_key = jax.random.uniform(kk, (n_embd, head_size), minval=-bound, maxval=bound, dtype=jnp.float32)
    w_query = jax.random.uniform(kq, (n_embd, head_size), minval=-bound, maxval=bound, dtype=jnp.float32)
    w_value = jax.random.uniform(kv, (n_embd, head_size), minval=-bound, maxval=bound, dtype=jnp.float32)

    # Fused / padded / pre-scaled weight is built once (module-init analogue),
    # not on every forward call.
    w_kqv = jax.block_until_ready(
        fuse_attention_head_weights(w_key, w_query, w_value, n_embd))

    out = attention_head(x, w_kqv, head_size)
    out = jax.block_until_ready(out)

    ref = attention_head_ref(x, w_key, w_query, w_value)
    assert out.shape == (D0, D1, head_size)
    assert jnp.allclose(out, ref, atol=1e-4, rtol=1e-4)

    print("KERNEL_OK")
</pallas_src>

<mosaic_0001>
module attributes {stable_mosaic.version = 11 : i64} {
  func.func @_attn_head_kernel(%arg0: i32, %arg1: memref<2x8x32xf32, #tpu.memory_space<vmem>>, %arg2: memref<32x384xf32, #tpu.memory_space<vmem>>, %arg3: memref<2x8x128xf32, #tpu.memory_space<vmem>>) attributes {dimension_semantics = [#tpu.dimension_semantics<parallel>], iteration_bounds = array<i64: 1>, scalar_prefetch = 0 : i64, scratch_operands = 0 : i64, tpu.core_type = #tpu.core_type<tc>, window_params = [{transform_indices = @transform_0, window_bounds = array<i64: 2, 8, 32>}, {pipeline_mode = #tpu.pipeline_mode<synchronous>, transform_indices = @transform_1, window_bounds = array<i64: 32, 384>}, {transform_indices = @transform_2, window_bounds = array<i64: 2, 8, 128>}]} {
    %c0 = arith.constant 0 : index
    %c0_0 = arith.constant 0 : index
    %c0_1 = arith.constant 0 : index
    %0 = vector.load %arg1[%c0, %c0_0, %c0_1] : memref<2x8x32xf32, #tpu.memory_space<vmem>>, vector<2x8x32xf32>
    %c0_2 = arith.constant 0 : index
    %c0_3 = arith.constant 0 : index
    %1 = vector.load %arg2[%c0_2, %c0_3] : memref<32x384xf32, #tpu.memory_space<vmem>>, vector<32x384xf32>
    %2 = vector.shape_cast %0 : vector<2x8x32xf32> to vector<16x32xf32>
    %cst = arith.constant dense<0.000000e+00> : vector<16x384xf32>
    %3 = tpu.matmul %2, %1, %cst {dimension_numbers = #tpu.dot_dimension_numbers<[1], [0], [0], [1], [0, 0, 1, 1], [], []>} : vector<16x32xf32>, vector<32x384xf32>, vector<16x384xf32> -> vector<16x384xf32>
    %4 = vector.shape_cast %3 : vector<16x384xf32> to vector<2x8x384xf32>
    %5 = vector.extract_strided_slice %4 {offsets = [0, 0, 0], sizes = [2, 8, 128], strides = [1, 1, 1]} : vector<2x8x384xf32> to vector<2x8x128xf32>
    %6 = vector.extract_strided_slice %4 {offsets = [0, 0, 128], sizes = [2, 8, 128], strides = [1, 1, 1]} : vector<2x8x384xf32> to vector<2x8x128xf32>
    %7 = vector.extract_strided_slice %4 {offsets = [0, 0, 256], sizes = [2, 8, 128], strides = [1, 1, 1]} : vector<2x8x384xf32> to vector<2x8x128xf32>
    "tpu.trace_start"() <{level = 10 : i32, message = "bqh,bkh->bqk"}> : () -> ()
    %cst_4 = arith.constant dense<0.000000e+00> : vector<2x8x8xf32>
    %8 = tpu.matmul %6, %5, %cst_4 {dimension_numbers = #tpu.dot_dimension_numbers<[2], [2], [1], [1], [0, 0, 0, 1, 1, 1], [0], [0]>} : vector<2x8x128xf32>, vector<2x8x128xf32>, vector<2x8x8xf32> -> vector<2x8x8xf32>
    "tpu.trace_stop"() : () -> ()
    %9 = tpu.iota {dimensions = array<i32: 0>} : vector<8x8xi32>
    %10 = tpu.iota {dimensions = array<i32: 1>} : vector<8x8xi32>
    %11 = arith.cmpi sge, %9, %10 : vector<8x8xi32>
    %12 = vector.shape_cast %11 : vector<8x8xi1> to vector<1x8x8xi1>
    %cst_5 = arith.constant -1.000000e+30 : f32
    %13 = vector.shape_cast %12 : vector<1x8x8xi1> to vector<1x8x8xi1>
    %14 = vector.broadcast %13 : vector<1x8x8xi1> to vector<2x8x8xi1>
    %15 = vector.broadcast %cst_5 : f32 to vector<2x8x8xf32>
    %16 = arith.select %14, %8, %15 : vector<2x8x8xi1>, vector<2x8x8xf32>
    %cst_6 = arith.constant dense<0xFF800000> : vector<2x8xf32>
    %17 = vector.multi_reduction <maximumf>, %16, %cst_6 [2] : vector<2x8x8xf32> to vector<2x8xf32>
    %18 = vector.shape_cast %17 : vector<2x8xf32> to vector<2x8x1xf32>
    %19 = vector.broadcast %18 : vector<2x8x1xf32> to vector<2x8x8xf32>
    %20 = arith.subf %16, %19 : vector<2x8x8xf32>
    %21 = math.exp %20 : vector<2x8x8xf32>
    %cst_7 = arith.constant dense<0.000000e+00> : vector<2x8xf32>
    %22 = vector.multi_reduction <add>, %21, %cst_7 [2] : vector<2x8x8xf32> to vector<2x8xf32>
    %23 = vector.shape_cast %22 : vector<2x8xf32> to vector<2x8x1xf32>
    %24 = tpu.reciprocal %23 : vector<2x8x1xf32> -> vector<2x8x1xf32>
    %25 = vector.broadcast %24 : vector<2x8x1xf32> to vector<2x8x8xf32>
    %26 = arith.mulf %21, %25 : vector<2x8x8xf32>
    "tpu.trace_start"() <{level = 10 : i32, message = "bqk,bkh->bqh"}> : () -> ()
    %cst_8 = arith.constant dense<0.000000e+00> : vector<2x8x128xf32>
    %27 = tpu.matmul %26, %7, %cst_8 {dimension_numbers = #tpu.dot_dimension_numbers<[2], [1], [1], [2], [0, 0, 0, 1, 1, 2], [0], [0]>} : vector<2x8x8xf32>, vector<2x8x128xf32>, vector<2x8x128xf32> -> vector<2x8x128xf32>
    "tpu.trace_stop"() : () -> ()
    %c0_9 = arith.constant 0 : index
    %c0_10 = arith.constant 0 : index
    %c0_11 = arith.constant 0 : index
    %28 = vector.load %arg3[%c0_9, %c0_10, %c0_11] : memref<2x8x128xf32, #tpu.memory_space<vmem>>, vector<2x8x128xf32>
    tpu.vector_store %arg3[%c0_9, %c0_10, %c0_11], %27 {strides = array<i32>} : memref<2x8x128xf32, #tpu.memory_space<vmem>>, vector<2x8x128xf32>,
    return
  }
  func.func @transform_0(%arg0: i32) -> (i32, i32, i32) {
    %c0_i32 = arith.constant 0 : i32
    %c0_i32_0 = arith.constant 0 : i32
    %c0_i32_1 = arith.constant 0 : i32
    return %arg0, %c0_i32, %c0_i32_0 : i32, i32, i32
  }
  func.func @transform_1(%arg0: i32) -> (i32, i32) {
    %c0_i32 = arith.constant 0 : i32
    %c0_i32_0 = arith.constant 0 : i32
    %c0_i32_1 = arith.constant 0 : i32
    return %c0_i32, %c0_i32_0 : i32, i32
  }
  func.func @transform_2(%arg0: i32) -> (i32, i32, i32) {
    %c0_i32 = arith.constant 0 : i32
    %c0_i32_0 = arith.constant 0 : i32
    %c0_i32_1 = arith.constant 0 : i32
    return %arg0, %c0_i32, %c0_i32_0 : i32, i32, i32
  }
}

</mosaic_0001>

<bundles_post_ra>
// kernel: tpu_custom_call.1
= control target key start
LH: loop header
LB: loop body
LE: loop exit
PB: predicated region body
PF: predicated region fallthrough
CT: control target
= control target key end

     0   :  { %7 = vsyncpa [#allocation3], 0  ;;  %s787_s0 = inlined_call_operand.hbm [shape: f32[2,8,32], index: 0, kind: input, shape index: {}]   ;;  %s788_s1 = inlined_call_operand.hbm [shape: f32[32,384], index: 1, kind: input, shape index: {}]   ;;  %s789_s2 = inlined_call_operand.hbm [shape: f32[2,8,128], index: 2, kind: output, shape index: {}]  }
   0x1   :  { %8 = vsyncpa [#allocation6], 0 }
   0x2   :  { %9 = vsyncpa [#allocation4], 0  ;;  %s707_s9 = smov [#allocation2]   ;;  %s635_s13 = scalar_lea.hbm %s787_s0, 256 }
   0x3   :  { %s15_s10 = sshll.u32 %s707_s9, 4  ;;  %p636_p0 = scmp.ne.s32.totalorder %s787_s0, %s635_s13  ;;  %s16_s10 = int_to_ptr.vmem [resolvable:$true] %s15_s10 }
   0x4   :  { %p639_p1 = scmp.lt.u32.totalorder %s635_s13, %s787_s0 }
   0x6   :  { %p641_p2 = pnand %p639_p1, %p636_p0 }
   0x8   :  { %644 = shalt.err (!%p641_p2)
}
   0x9   :  { %s645_s18 = scalar_lea.vmem %s16_s10, 256  ;;  %p650_p4 = scmp.lt.s32.totalorder %s16_s10, %s16_s10 }
   0xa   :  { %p646_p3 = scmp.ne.s32.totalorder %s16_s10, %s645_s18  ;;  %p651_p5 = scmp.lt.s32.totalorder %s645_s18, %s645_s18 }
   0xc   :  { %p652_p6 = por %p651_p5, %p650_p4 }
   0xe   :  { %p653_p7 = pnand %p652_p6, %p646_p3 }
  0x10   :  { %656 = shalt.err (!%p653_p7)
}
  0x11   :  { %s708_s19 = smov 128   ;;  %s709_s20 = smov 8  }
  0x12   :  { %21 = dma.hbm_to_vmem [thread:$0]  %s787_s0, 256, %s16_s10, [#allocation3], %s708_s19, %s708_s19, %s709_s20  }
  0x13   :  { %s710_s23 = smov [#allocation5]   ;;  %s657_s27 = scalar_lea.hbm %s788_s1, 1536 }
  0x14   :  { %s27_s24 = sshll.u32 %s710_s23, 4  ;;  %p658_p8 = scmp.ne.s32.totalorder %s788_s1, %s657_s27  ;;  %s28_s24 = int_to_ptr.vmem [resolvable:$true] %s27_s24 }
  0x15   :  { %p661_p9 = scmp.lt.u32.totalorder %s657_s27, %s788_s1 }
  0x17   :  { %p663_p10 = pnand %p661_p9, %p658_p8 }
  0x19   :  { %666 = shalt.err (!%p663_p10)
}
  0x1a   :  { %s667_s4 = scalar_lea.vmem %s28_s24, 1536  ;;  %p672_p12 = scmp.lt.s32.totalorder %s28_s24, %s28_s24 }
  0x1b   :  { %p668_p11 = scmp.ne.s32.totalorder %s28_s24, %s667_s4  ;;  %p673_p13 = scmp.lt.s32.totalorder %s667_s4, %s667_s4 }
  0x1d   :  { %p674_p0 = por %p673_p13, %p672_p12 }
  0x1f   :  { %p675_p1 = pnand %p674_p0, %p668_p11 }
  0x21   :  { %678 = shalt.err (!%p675_p1)
}
  0x22   :  { %s711_s0 = smov 384   ;;  %s712_s5 = smov 24  }
  0x23   :  { %33 = dma.hbm_to_vmem [thread:$0]  %s788_s1, 1536, %s28_s24, [#allocation6], %s711_s0, %s711_s0, %s712_s5  }
  0x24   :  { %701 = dma.done.wait [#allocation3], 256  }
  0x25   :  { %702 = vsyncadd [#allocation3], 4294967040 }
  0x26   :  { %703 = dma.done.wait [#allocation6], 1536  }
  0x27   :  { %704 = vsyncadd [#allocation6], 4294965760  ;;  %v713_v0 = vmov 0.0   ;;  %v43_v1 = vld [vmem:[#allocation5 + $0x8] sm:$0xff]  ;;  %v46_v2 = vld [vmem:[#allocation5 + $0x20] sm:$0xff]  ;;  %vm54_vm0 = vcmask 261120   ;;  %v353_v27 = vlaneseq }
  0x28   :  { %125 = vmatprep.mubr.f32.mxu0 %v713_v0  ;;  %v42_v3 = vld [vmem:[#allocation5] sm:$0xff]  ;;  %v602_v4 = vpack.c.bf16 %v46_v2, %v43_v1  ;;  %v45_v5 = vld [vmem:[#allocation5 + $0x18] sm:$0xff]  ;;  %v52_v7 = vld [vmem:[#allocation5 + $0x50] sm:$0xff]  ;;  %vm714_vm1 = vmmov 0   ;;  %vm362_vm3 = vcmask 64512   ;;  %s715_s1 = smov [#allocation7]  }
  0x29   :  { %v49_v6 = vld [vmem:[#allocation5 + $0x38] sm:$0xff]  ;;  %v604_v8 = vpack.c.bf16 %v45_v5, %v42_v3  ;;  %v48_v10 = vld [vmem:[#allocation5 + $0x30] sm:$0xff]  ;;  %v51_v11 = vld [vmem:[#allocation5 + $0x48] sm:$0xff]  ;;  %v354_v28 = vshrl.u32 %v353_v27, 7  ;;  %v356_v29 = vand.u32 127, %v353_v27  ;;  %s538_s8 = sshll.u32 %s715_s1, 4  ;;  %s539_s8 = int_to_ptr.vmem [resolvable:$true] %s538_s8 }
  0x2a   :  { %v606_v9 = vpack.c.bf16 %v52_v7, %v49_v6  ;;  %v40_v12 = vld [vmem:[#allocation2] sm:$0xff]  ;;  %603 = vmatprep.subr.bf16.mxu0 %v602_v4  ;;  %v47_v14 = vld [vmem:[#allocation5 + $0x28] sm:$0xff]  ;;  %v608_v15 = vpack.c.bf16 %v51_v11, %v48_v10  ;;  %v50_v17 = vld [vmem:[#allocation5 + $0x40] sm:$0xff]  ;;  %s679_s9 = scalar_lea.vmem %s539_s8, 256  ;;  %p684_p3 = scmp.lt.s32.totalorder %s539_s8, %s539_s8 }
  0x2b   :  { %v44_v13 = vld [vmem:[#allocation5 + $0x10] sm:$0xff]  ;;  %579 = vmatprep.mubr.msk.f32.mxu1 %vm54_vm0, %v40_v12  ;;  %605 = vmatpush1.bf16.msra.mxu0 %v604_v8  ;;  %v53_v18 = vld [vmem:[#allocation5 + $0x58] sm:$0xff]  ;;  %vm357_vm2 = vcmp.ge.s32.totalorder %v354_v28, %v356_v29  ;;  %p680_p2 = scmp.ne.s32.totalorder %s539_s8, %s679_s9  ;;  %p685_p4 = scmp.lt.s32.totalorder %s679_s9, %s679_s9 }
  0x2c   :  { %v610_v16 = vpack.c.bf16 %v47_v14, %v44_v13  ;;  %607 = vmatprep.subr.bf16.mxu0 %v606_v9  ;;  %v614_v19 = vpack.c.bf16 %v53_v18, %v50_v17  ;;  %v41_v20 = vld [vmem:[#allocation2 + $0x8] sm:$0xff] }
  0x2d   :  { %p686_p5 = por %p685_p4, %p684_p3 }
  0x2e   :  { %611 = vmatprep.subr.bf16.mxu1 %v610_v16 }
  0x2f   :  { %613 = vmatpush3.bf16.msra.mxu1 %v610_v16  ;;  %609 = vmatpush1.bf16.msra.mxu0 %v608_v15  ;;  %p687_p6 = pnand %p686_p5, %p680_p2 }
  0x30   :  { %615 = vmatprep.subr.bf16.mxu1 %v614_v19  ;;  %587 = vmatprep.subr.mxu0 %v713_v0 }
  0x32   :  { %551 = vmatmul.mubr.msk.f32.vlgmr.msra.gmra.mrb[0].mxu0 %vm54_vm0, %v40_v12 }
  0x33   :  { %617 = vmatpush3.bf16.msra.mxu1 %v614_v19  ;;  %131 = vmatprep.mubr.f32.mxu0 %v713_v0 }
  0x34   :  { %582 = vmatprep.subr.mxu1 %v713_v0 }
  0x36   :  { %580 = vmatmul.mubr.msk.f32.vlgmr.msra.gmra.mrb[0].mxu1 %vm54_vm0, %v41_v20  ;;  %552 = vmatmul.mubr.msk.f32.gmra.mrb[2].mxu0 %vm54_vm0, %v41_v20 }
  0x37   :  { %584 = vmatprep.mubr.msk.f32.mxu1 %vm714_vm1, %v713_v0  ;;  %589 = vmatprep.mubr.msk.f32.mxu0 %vm714_vm1, %v713_v0 }
 0x105   :  { %v127_v21 = vpop.f32.mrb[0].mxu0 }
 0x106   :  { %v129_v22 = vpop.f32.mrb[1].mxu0  ;;  %583 = vmatpush3.xpose.msra.mxu1 %v127_v21 }
 0x107   :  { %592 = vmatprep.subr.mxu1 %v713_v0 }
 0x109   :  { %v581_v23 = vpop.f32.mrb[0].mxu1  ;;  %v133_v24 = vpop.f32.mrb[2].mxu0  ;;  %585 = vmatmul.mubr.f32.vlgmr.msra.gmra.mrb[2].mxu1 %v129_v22 }
 0x10a   :  { %v204_v25 = vpop.f32.mrb[1].mxu1  ;;  %v135_v26 = vpop.f32.mrb[3].mxu0  ;;  %588 = vmatpush3.xpose.msra.mxu0 %v133_v24  ;;  %594 = vmatprep.mubr.msk.f32.mxu1 %vm714_vm1, %v713_v0 }
 0x10b   :  { %593 = vmatpush3.msra.mxu1 %v204_v25  ;;  %597 = vmatprep.subr.mxu0 %v713_v0 }
 0x10d   :  { %590 = vmatmul.mubr.f32.vlgmr.msra.gmra.mrb[4].mxu0 %v135_v26 }
 0x10e   :  { %598 = vmatpush3.msra.mxu0 %v581_v23  ;;  %599 = vmatprep.mubr.msk.f32.mxu0 %vm714_vm1, %v713_v0 }
 0x1dc   :  { %v279_v30 = vpop.f32.mrb[2].mxu1 }
 0x1dd   :  { %v360_v31 = vsel %vm357_vm2, %v279_v30, -1e+30  ;;  %v586_v32 = vpop.f32.mrb[3].mxu1 }
 0x1de   :  { %v363_v33 = vsel %vm362_vm3, %v360_v31, -inf }
 0x1df   :  { %364 = vmax.xlane.f32.xlu0 %v363_v33 }
 0x1e0   :  { %v349_v34 = vpop.f32.mrb[4].mxu0 }
 0x1e1   :  { %v361_v35 = vsel %vm357_vm2, %v349_v34, -1e+30  ;;  %v591_v36 = vpop.f32.mrb[5].mxu0 }
 0x1e2   :  { %v366_v37 = vsel %vm362_vm3, %v361_v35, -inf }
 0x1e3   :  { %367 = vmax.xlane.f32.xlu0 %v366_v37 }
 0x26c   :  { %v365_v38 = vpop.xlane.xlu0 %364 }
 0x26d   :  { %v369_v39 = vsub.f32 %v360_v31, %v365_v38 }
 0x26f   :  { %v371_v40 = vmul.f32 1.442695, %v369_v39 }
 0x270   :  { %v368_v41 = vpop.xlane.xlu0 %367 }
 0x271   :  { %627 = vpow2.f32 %v371_v40  ;;  %v370_v42 = vsub.f32 %v361_v35, %v368_v41 }
 0x273   :  { %v373_v43 = vmul.f32 1.442695, %v370_v42 }
 0x275   :  { %629 = vpow2.f32 %v373_v43 }
 0x27b   :  { %v628_v44 = vpop.eup %627 }
 0x27c   :  { %v375_v45 = vsel %vm362_vm3, %v628_v44, 0.0 }
 0x27d   :  { %376 = vadd.xlane.f32.xlu1 %v375_v45 }
 0x27f   :  { %v630_v46 = vpop.eup %629 }
 0x280   :  { %v378_v47 = vsel %vm362_vm3, %v630_v46, 0.0 }
 0x281   :  { %379 = vadd.xlane.f32.xlu1 %v378_v47 }
 0x30a   :  { %v377_v48 = vpop.xlane.xlu1 %376 }
 0x30b   :  { %631 = vrcp.f32 %v377_v48 }
 0x30e   :  { %v380_v49 = vpop.xlane.xlu1 %379 }
 0x30f   :  { %633 = vrcp.f32 %v380_v49 }
 0x315   :  { %v632_v50 = vpop.eup %631 }
 0x316   :  { %v383_v51 = vmul.f32 %v632_v50, %v628_v44 }
 0x318   :  { %595 = vmatmul.mubr.msk.f32.vlgmr.msra.gmra.mrb[4].mxu1 %vm362_vm3, %v383_v51 }
 0x319   :  { %v634_v52 = vpop.eup %633 }
 0x31a   :  { %v384_v53 = vmul.f32 %v634_v52, %v630_v46 }
 0x31c   :  { %600 = vmatmul.mubr.msk.f32.vlgmr.msra.gmra.mrb[6].mxu0 %vm362_vm3, %v384_v53 }
 0x3eb   :  { %v454_v54 = vpop.f32.mrb[4].mxu1 }
 0x3ec   :  { %531 = vst [vmem:[#allocation7] sm:$0xff] %v454_v54  ;;  %v596_v55 = vpop.f32.mrb[5].mxu1 }
 0x3ef   :  { %v527_v56 = vpop.f32.mrb[6].mxu0 }
 0x3f0   :  { %532 = vst [vmem:[#allocation7 + $0x8] sm:$0xff] %v527_v56  ;;  %v601_v57 = vpop.f32.mrb[7].mxu0 }
 0x3f1   :  { %690 = shalt.err (!%p687_p6)
}
 0x3f2   :  { %s691_s12 = scalar_lea.hbm %s789_s2, 256 }
 0x3f3   :  { %p692_p7 = scmp.ne.s32.totalorder %s789_s2, %s691_s12  ;;  %p695_p8 = scmp.lt.u32.totalorder %s691_s12, %s789_s2 }
 0x3f5   :  { %p697_p9 = pnand %p695_p8, %p692_p7 }
 0x3f7   :  { %700 = shalt.err (!%p697_p9)
}
 0x3f8   :  { %544 = dma.vmem_to_hbm [thread:$0]  %s539_s8, 256, %s789_s2, [#allocation4], %s708_s19, %s708_s19, %s709_s20  }
 0x3f9   :  { %705 = dma.done.wait [#allocation4], 256  }
 0x3fa   :  { %706 = vsyncadd [#allocation4], 4294967040 }
 0x3fb   :  { %548 = vsyncpa [#allocation3], 1 }
 0x3fc   :  { %549 = vsyncpa [#allocation6], 1 }
 0x3fd   :  { %550 = vsyncpa [#allocation4], 1 }

</bundles_post_ra>
